<compile_context>
chip_gen: v7x
topology: tpu7x:2x2x1
jax: 0.10.0
libtpu: 0.0.40
codegen_flags: <defaults>
</compile_context>

<pallas_src>
import jax
import jax.numpy as jnp
from jax.experimental import pallas as pl
from jax.experimental.pallas import tpu as pltpu


def etr_loss_trace_kernel(a_ref, c_full_ref, c_blk_ref, isumc_ref, isumcdc_ref,
                          out_ref, sA_ref, dx_ref, z_ref):
    i = pl.program_id(0)

    @pl.when(i == 0)
    def _init():
        sA_ref[...] = jnp.zeros_like(sA_ref)
        dx_ref[...] = jnp.zeros_like(dx_ref)
        z_ref[...] = jnp.zeros_like(z_ref)

    A_blk = a_ref[...].astype(jnp.float32)          # (tm, n)   row block of A
    C_full = c_full_ref[...].astype(jnp.float32)    # (n, k)    full C (for A @ C)
    C_blk = c_blk_ref[...].astype(jnp.float32)      # (tm, k)   matching rows of C
    IsumC_blk = isumc_ref[...].astype(jnp.float32)  # (k, tm)   matching cols of IsumC

    # (tm, k) block of A @ C
    AC_blk = jnp.dot(A_blk, C_full, preferred_element_type=jnp.float32)

    # Running reductions.
    sA_ref[...] = sA_ref[...] + jnp.sum(A_blk, keepdims=True)                       # (1,1)
    dx_ref[...] = dx_ref[...] + jnp.sum(C_blk * AC_blk, axis=0, keepdims=True)      # (1,k) diag(C^T·AC)
    z_ref[...] = z_ref[...] + jnp.dot(IsumC_blk, AC_blk,
                                      preferred_element_type=jnp.float32)           # (k,k) IsumC·AC

    @pl.when(i == pl.num_programs(0) - 1)
    def _finalize():
        sA = sA_ref[...]                                    # (1,1)
        Z = z_ref[...]                                      # (k,k)
        Dt = isumcdc_ref[...].astype(jnp.float32).T         # tiny (k,k) XLU transpose
        dW = jnp.sum(Dt * Z, axis=0, keepdims=True)         # (1,k) = diag(IsumCDC @ Z)
        dY = jnp.log2(dW / sA)                              # (1,k) diag of log2 term
        dX = dx_ref[...]                                    # (1,k)
        out_ref[...] = (jnp.sum(dX * dY, axis=1, keepdims=True) / sA).astype(out_ref.dtype)


def etr_loss_trace(A, C, IsumC, IsumCDC, *, block_rows=None):
    """Pallas TPU implementation of ETR_loss_trace.forward(A, C, IsumC, IsumCDC)."""
    n, k = C.shape
    assert A.shape == (n, n)
    assert IsumC.shape == (k, n)
    assert IsumCDC.shape == (k, k)

    # Choose the row-block size tm. Blocked path requires tm | n, tm % 8 == 0
    # (sublane) and tm % 128 == 0 (IsumC block's lane dim); otherwise single block.
    if block_rows is None:
        tm = n
        if n > 512:
            for cand in (512, 256, 128):
                if n % cand == 0:
                    tm = cand
                    break
    else:
        tm = block_rows
    if tm != n and (n % tm != 0 or tm % 128 != 0):
        tm = n
    grid = (n // tm,)

    out = pl.pallas_call(
        etr_loss_trace_kernel,
        out_shape=jax.ShapeDtypeStruct((1, 1), jnp.float32),
        grid_spec=pltpu.PrefetchScalarGridSpec(
            num_scalar_prefetch=0,
            grid=grid,
            in_specs=[
                pl.BlockSpec((tm, n), lambda i: (i, 0)),   # A row block
                pl.BlockSpec((n, k), lambda i: (0, 0)),    # C (full, rhs of A @ C)
                pl.BlockSpec((tm, k), lambda i: (i, 0)),   # C row block (diag X)
                pl.BlockSpec((k, tm), lambda i: (0, i)),   # IsumC column block
                pl.BlockSpec((k, k), lambda i: (0, 0)),    # IsumCDC (used at finalize)
            ],
            out_specs=pl.BlockSpec((1, 1), lambda i: (0, 0)),
            scratch_shapes=[
                pltpu.VMEM((1, 1), jnp.float32),   # running sum(A)
                pltpu.VMEM((1, k), jnp.float32),   # running diag(C^T · A · C)
                pltpu.VMEM((k, k), jnp.float32),   # running IsumC · A · C
            ],
        ),
        compiler_params=pltpu.CompilerParams(
            dimension_semantics=("arbitrary",)),   # reduction axis over A's rows
    )(A, C, C, IsumC, IsumCDC)
    return out[0, 0]


def etr_loss_trace_ref(A, C, IsumC, IsumCDC):
    inv_sA = 1.0 / jnp.sum(A)
    AC = A @ C
    X = inv_sA * (C.T @ AC)
    Y = jnp.log2(IsumCDC @ ((IsumC @ AC) * inv_sA))
    return jnp.trace(X * Y)


if __name__ == "__main__":
    def make_inputs(key, n, k):
        k1, k2, k3, k4 = jax.random.split(key, 4)
        # Positive entries so the log2 argument is strictly positive.
        A = jax.random.uniform(k1, (n, n), dtype=jnp.float32, minval=0.1, maxval=1.0)
        C = jax.random.uniform(k2, (n, k), dtype=jnp.float32, minval=0.1, maxval=1.0)
        IsumC = jax.random.uniform(k3, (k, n), dtype=jnp.float32, minval=0.1, maxval=1.0)
        IsumCDC = jax.random.uniform(k4, (k, k), dtype=jnp.float32, minval=0.1, maxval=1.0)
        return A, C, IsumC, IsumCDC

    key = jax.random.PRNGKey(0)
    key_small, key_big = jax.random.split(key)

    # Small shape (matches module-scale test; single block, grid=(1,)).
    A, C, IsumC, IsumCDC = make_inputs(key_small, 16, 8)
    out = jax.block_until_ready(etr_loss_trace(A, C, IsumC, IsumCDC))
    ref = jax.block_until_ready(etr_loss_trace_ref(A, C, IsumC, IsumCDC))
    assert jnp.allclose(out, ref, rtol=1e-3, atol=1e-3), (out, ref)

    # Moderately larger shape exercising the blocked row-reduction pipeline (grid=(2,)).
    A2, C2, IsumC2, IsumCDC2 = make_inputs(key_big, 256, 128)
    out2 = jax.block_until_ready(etr_loss_trace(A2, C2, IsumC2, IsumCDC2, block_rows=128))
    ref2 = jax.block_until_ready(etr_loss_trace_ref(A2, C2, IsumC2, IsumCDC2))
    assert jnp.allclose(out2, ref2, rtol=1e-3, atol=1e-3), (out2, ref2)

    print("KERNEL_OK")
</pallas_src>

<mosaic_0001>
module attributes {stable_mosaic.version = 11 : i64} {
  func.func @etr_loss_trace_kernel(%arg0: i32, %arg1: memref<16x16xf32, #tpu.memory_space<vmem>>, %arg2: memref<16x8xf32, #tpu.memory_space<vmem>>, %arg3: memref<16x8xf32, #tpu.memory_space<vmem>>, %arg4: memref<8x16xf32, #tpu.memory_space<vmem>>, %arg5: memref<8x8xf32, #tpu.memory_space<vmem>>, %arg6: memref<1x1xf32, #tpu.memory_space<vmem>>, %arg7: memref<1x1xf32, #tpu.memory_space<vmem>>, %arg8: memref<1x8xf32, #tpu.memory_space<vmem>>, %arg9: memref<8x8xf32, #tpu.memory_space<vmem>>) attributes {dimension_semantics = [#tpu.dimension_semantics<arbitrary>], iteration_bounds = array<i64: 1>, scalar_prefetch = 0 : i64, scratch_operands = 3 : i64, tpu.core_type = #tpu.core_type<tc>, window_params = [{transform_indices = @transform_0, window_bounds = array<i64: 16, 16>}, {pipeline_mode = #tpu.pipeline_mode<synchronous>, transform_indices = @transform_1, window_bounds = array<i64: 16, 8>}, {transform_indices = @transform_2, window_bounds = array<i64: 16, 8>}, {transform_indices = @transform_3, window_bounds = array<i64: 8, 16>}, {pipeline_mode = #tpu.pipeline_mode<synchronous>, transform_indices = @transform_4, window_bounds = array<i64: 8, 8>}, {pipeline_mode = #tpu.pipeline_mode<synchronous>, transform_indices = @transform_5, window_bounds = array<i64: 1, 1>}]} {
    %c0_i32 = arith.constant 0 : i32
    %0 = arith.cmpi eq, %arg0, %c0_i32 : i32
    %1 = arith.extui %0 : i1 to i32
    %c0_i32_0 = arith.constant 0 : i32
    %2 = arith.cmpi ne, %1, %c0_i32_0 : i32
    scf.if %2 {
      %cst_25 = arith.constant 0.000000e+00 : f32
      %29 = vector.broadcast %cst_25 : f32 to vector<1x1xf32>
      %c0_26 = arith.constant 0 : index
      %c0_27 = arith.constant 0 : index
      %30 = vector.load %arg7[%c0_26, %c0_27] : memref<1x1xf32, #tpu.memory_space<vmem>>, vector<1x1xf32>
      tpu.vector_store %arg7[%c0_26, %c0_27], %29 {strides = array<i32>} : memref<1x1xf32, #tpu.memory_space<vmem>>, vector<1x1xf32>,
      %cst_28 = arith.constant 0.000000e+00 : f32
      %31 = vector.broadcast %cst_28 : f32 to vector<1x8xf32>
      %c0_29 = arith.constant 0 : index
      %c0_30 = arith.constant 0 : index
      %32 = vector.load %arg8[%c0_29, %c0_30] : memref<1x8xf32, #tpu.memory_space<vmem>>, vector<1x8xf32>
      tpu.vector_store %arg8[%c0_29, %c0_30], %31 {strides = array<i32>} : memref<1x8xf32, #tpu.memory_space<vmem>>, vector<1x8xf32>,
      %cst_31 = arith.constant 0.000000e+00 : f32
      %33 = vector.broadcast %cst_31 : f32 to vector<8x8xf32>
      %c0_32 = arith.constant 0 : index
      %c0_33 = arith.constant 0 : index
      %34 = vector.load %arg9[%c0_32, %c0_33] : memref<8x8xf32, #tpu.memory_space<vmem>>, vector<8x8xf32>
      tpu.vector_store %arg9[%c0_32, %c0_33], %33 {strides = array<i32>} : memref<8x8xf32, #tpu.memory_space<vmem>>, vector<8x8xf32>,
    } else {
    }
    %c0 = arith.constant 0 : index
    %c0_1 = arith.constant 0 : index
    %3 = vector.load %arg1[%c0, %c0_1] : memref<16x16xf32, #tpu.memory_space<vmem>>, vector<16x16xf32>
    %c0_2 = arith.constant 0 : index
    %c0_3 = arith.constant 0 : index
    %4 = vector.load %arg2[%c0_2, %c0_3] : memref<16x8xf32, #tpu.memory_space<vmem>>, vector<16x8xf32>
    %c0_4 = arith.constant 0 : index
    %c0_5 = arith.constant 0 : index
    %5 = vector.load %arg3[%c0_4, %c0_5] : memref<16x8xf32, #tpu.memory_space<vmem>>, vector<16x8xf32>
    %c0_6 = arith.constant 0 : index
    %c0_7 = arith.constant 0 : index
    %6 = vector.load %arg4[%c0_6, %c0_7] : memref<8x16xf32, #tpu.memory_space<vmem>>, vector<8x16xf32>
    %cst = arith.constant dense<0.000000e+00> : vector<16x8xf32>
    %7 = tpu.matmul %3, %4, %cst {dimension_numbers = #tpu.dot_dimension_numbers<[1], [0], [0], [1], [0, 0, 1, 1], [], []>} : vector<16x16xf32>, vector<16x8xf32>, vector<16x8xf32> -> vector<16x8xf32>
    %c0_8 = arith.constant 0 : index
    %c0_9 = arith.constant 0 : index
    %8 = vector.load %arg7[%c0_8, %c0_9] : memref<1x1xf32, #tpu.memory_space<vmem>>, vector<1x1xf32>
    %9 = vector.shape_cast %3 : vector<16x16xf32> to vector<1x16x16xf32>
    %cst_10 = arith.constant dense<0.000000e+00> : vector<1xf32>
    %10 = vector.multi_reduction <add>, %9, %cst_10 [1, 2] : vector<1x16x16xf32> to vector<1xf32>
    %11 = vector.shape_cast %10 : vector<1xf32> to vector<1x1x1xf32>
    %12 = vector.extract %11[0, 0, 0] : f32 from vector<1x1x1xf32>
    %13 = vector.broadcast %12 : f32 to vector<1x1xf32>
    %14 = arith.addf %8, %13 : vector<1x1xf32>
    %c0_11 = arith.constant 0 : index
    %c0_12 = arith.constant 0 : index
    %15 = vector.load %arg7[%c0_11, %c0_12] : memref<1x1xf32, #tpu.memory_space<vmem>>, vector<1x1xf32>
    tpu.vector_store %arg7[%c0_11, %c0_12], %14 {strides = array<i32>} : memref<1x1xf32, #tpu.memory_space<vmem>>, vector<1x1xf32>,
    %c0_13 = arith.constant 0 : index
    %c0_14 = arith.constant 0 : index
    %16 = vector.load %arg8[%c0_13, %c0_14] : memref<1x8xf32, #tpu.memory_space<vmem>>, vector<1x8xf32>
    %17 = arith.mulf %5, %7 : vector<16x8xf32>
    %cst_15 = arith.constant dense<0.000000e+00> : vector<8xf32>
    %18 = vector.multi_reduction <add>, %17, %cst_15 [0] : vector<16x8xf32> to vector<8xf32>
    %19 = vector.shape_cast %18 : vector<8xf32> to vector<1x8xf32>
    %20 = arith.addf %16, %19 : vector<1x8xf32>
    %c0_16 = arith.constant 0 : index
    %c0_17 = arith.constant 0 : index
    %21 = vector.load %arg8[%c0_16, %c0_17] : memref<1x8xf32, #tpu.memory_space<vmem>>, vector<1x8xf32>
    tpu.vector_store %arg8[%c0_16, %c0_17], %20 {strides = array<i32>} : memref<1x8xf32, #tpu.memory_space<vmem>>, vector<1x8xf32>,
    %c0_18 = arith.constant 0 : index
    %c0_19 = arith.constant 0 : index
    %22 = vector.load %arg9[%c0_18, %c0_19] : memref<8x8xf32, #tpu.memory_space<vmem>>, vector<8x8xf32>
    %cst_20 = arith.constant dense<0.000000e+00> : vector<8x8xf32>
    %23 = tpu.matmul %6, %7, %cst_20 {dimension_numbers = #tpu.dot_dimension_numbers<[1], [0], [0], [1], [0, 0, 1, 1], [], []>} : vector<8x16xf32>, vector<16x8xf32>, vector<8x8xf32> -> vector<8x8xf32>
    %24 = arith.addf %22, %23 : vector<8x8xf32>
    %c0_21 = arith.constant 0 : index
    %c0_22 = arith.constant 0 : index
    %25 = vector.load %arg9[%c0_21, %c0_22] : memref<8x8xf32, #tpu.memory_space<vmem>>, vector<8x8xf32>
    tpu.vector_store %arg9[%c0_21, %c0_22], %24 {strides = array<i32>} : memref<8x8xf32, #tpu.memory_space<vmem>>, vector<8x8xf32>,
    %c0_i32_23 = arith.constant 0 : i32
    %26 = arith.cmpi eq, %arg0, %c0_i32_23 : i32
    %27 = arith.extui %26 : i1 to i32
    %c0_i32_24 = arith.constant 0 : i32
    %28 = arith.cmpi ne, %27, %c0_i32_24 : i32
    scf.if %28 {
      %c0_25 = arith.constant 0 : index
      %c0_26 = arith.constant 0 : index
      %29 = vector.load %arg7[%c0_25, %c0_26] : memref<1x1xf32, #tpu.memory_space<vmem>>, vector<1x1xf32>
      %c0_27 = arith.constant 0 : index
      %c0_28 = arith.constant 0 : index
      %30 = vector.load %arg9[%c0_27, %c0_28] : memref<8x8xf32, #tpu.memory_space<vmem>>, vector<8x8xf32>
      %c0_29 = arith.constant 0 : index
      %c0_30 = arith.constant 0 : index
      %31 = vector.load %arg5[%c0_29, %c0_30] : memref<8x8xf32, #tpu.memory_space<vmem>>, vector<8x8xf32>
      %32 = tpu.transpose %31, [1, 0] : vector<8x8xf32> -> vector<8x8xf32>
      %33 = arith.mulf %32, %30 : vector<8x8xf32>
      %cst_31 = arith.constant dense<0.000000e+00> : vector<8xf32>
      %34 = vector.multi_reduction <add>, %33, %cst_31 [0] : vector<8x8xf32> to vector<8xf32>
      %35 = vector.shape_cast %34 : vector<8xf32> to vector<1x8xf32>
      %36 = vector.broadcast %29 : vector<1x1xf32> to vector<1x8xf32>
      %37 = arith.divf %35, %36 : vector<1x8xf32>
      %38 = math.log %37 : vector<1x8xf32>
      %cst_32 = arith.constant 2.000000e+00 : f32
      %39 = math.log %cst_32 : f32
      %40 = vector.broadcast %39 : f32 to vector<1x8xf32>
      %41 = arith.divf %38, %40 : vector<1x8xf32>
      %c0_33 = arith.constant 0 : index
      %c0_34 = arith.constant 0 : index
      %42 = vector.load %arg8[%c0_33, %c0_34] : memref<1x8xf32, #tpu.memory_space<vmem>>, vector<1x8xf32>
      %43 = arith.mulf %42, %41 : vector<1x8xf32>
      %cst_35 = arith.constant dense<0.000000e+00> : vector<1xf32>
      %44 = vector.multi_reduction <add>, %43, %cst_35 [1] : vector<1x8xf32> to vector<1xf32>
      %45 = vector.shape_cast %44 : vector<1xf32> to vector<1x1xf32>
      %46 = arith.divf %45, %29 : vector<1x1xf32>
      %c0_36 = arith.constant 0 : index
      %c0_37 = arith.constant 0 : index
      %47 = vector.load %arg6[%c0_36, %c0_37] : memref<1x1xf32, #tpu.memory_space<vmem>>, vector<1x1xf32>
      tpu.vector_store %arg6[%c0_36, %c0_37], %46 {strides = array<i32>} : memref<1x1xf32, #tpu.memory_space<vmem>>, vector<1x1xf32>,
    } else {
    }
    return
  }
  func.func @transform_0(%arg0: i32) -> (i32, i32) {
    %c0_i32 = arith.constant 0 : i32
    %c0_i32_0 = arith.constant 0 : i32
    return %arg0, %c0_i32 : i32, i32
  }
  func.func @transform_1(%arg0: i32) -> (i32, i32) {
    %c0_i32 = arith.constant 0 : i32
    %c0_i32_0 = arith.constant 0 : i32
    %c0_i32_1 = arith.constant 0 : i32
    return %c0_i32, %c0_i32_0 : i32, i32
  }
  func.func @transform_2(%arg0: i32) -> (i32, i32) {
    %c0_i32 = arith.constant 0 : i32
    %c0_i32_0 = arith.constant 0 : i32
    return %arg0, %c0_i32 : i32, i32
  }
  func.func @transform_3(%arg0: i32) -> (i32, i32) {
    %c0_i32 = arith.constant 0 : i32
    %c0_i32_0 = arith.constant 0 : i32
    return %c0_i32, %arg0 : i32, i32
  }
  func.func @transform_4(%arg0: i32) -> (i32, i32) {
    %c0_i32 = arith.constant 0 : i32
    %c0_i32_0 = arith.constant 0 : i32
    %c0_i32_1 = arith.constant 0 : i32
    return %c0_i32, %c0_i32_0 : i32, i32
  }
  func.func @transform_5(%arg0: i32) -> (i32, i32) {
    %c0_i32 = arith.constant 0 : i32
    %c0_i32_0 = arith.constant 0 : i32
    %c0_i32_1 = arith.constant 0 : i32
    return %c0_i32, %c0_i32_0 : i32, i32
  }
}

</mosaic_0001>

<bundles_post_ra>
// kernel: tpu_custom_call.1
= control target key start
LH: loop header
LB: loop body
LE: loop exit
PB: predicated region body
PF: predicated region fallthrough
CT: control target
= control target key end

     0   :  { %vm38_vm0 = vcmask 130048   ;;  %s468_s0 = inlined_call_operand.vmem [shape: f32[16,16], index: 0, kind: input, shape index: {}]   ;;  %s469_s1 = inlined_call_operand.vmem [shape: f32[16,8], index: 1, kind: input, shape index: {}]   ;;  %s470_s2 = inlined_call_operand.vmem [shape: f32[16,8], index: 2, kind: input, shape index: {}]   ;;  %s471_s3 = inlined_call_operand.vmem [shape: f32[8,16], index: 3, kind: input, shape index: {}]   ;;  %s472_s4 = inlined_call_operand.vmem [shape: f32[8,8], index: 4, kind: input, shape index: {}]   ;;  %s473_s5 = inlined_call_operand.hbm [shape: f32[1,1], index: 5, kind: output, shape index: {}]  }
   0x1   :  { %v33_v0 = vld [vmem:[%s469_s1] sm:$0xff]  ;;  %v34_v1 = vld [vmem:[%s469_s1 + $0x8] sm:$0xff] }
   0x2   :  { %v31_v2 = vld [vmem:[%s468_s0] sm:$0xff]  ;;  %v336_v3 = vpack.c.bf16 %v34_v1, %v33_v0  ;;  %v32_v4 = vld [vmem:[%s468_s0 + $0x8] sm:$0xff] }
   0x3   :  { %326 = vmatprep.mubr.msk.f32.mxu0 %vm38_vm0, %v31_v2  ;;  %v121_v5 = vsel %vm38_vm0, %v31_v2, 0.0 }
   0x4   :  { %10 = vsyncpa [#allocation6], 0  ;;  %v122_v6 = vsel %vm38_vm0, %v32_v4, 0.0  ;;  %337 = vmatprep.subr.bf16.mxu0 %v336_v3  ;;  %v381_v8 = vmov 0.0|0.0   ;;  %vm29_vm1 = vcmask 64512   ;;  %v382_v9 = vmov 0.0  }
   0x5   :  { %v123_v7 = vadd.f32 %v122_v6, %v121_v5  ;;  %339 = vmatpush3.bf16.msra.mxu0 %v336_v3  ;;  %340 = vmatprep.subr.bf16.mxu1 %v381_v8  ;;  %30 = vst.msk [vmem:[#allocation4] sm:$0xff] %vm29_vm1, %v382_v9  ;;  %vm383_vm2 = vmmov 0   ;;  %vm27_vm3 = vcmask 57344   ;;  %vm25_vm4 = vcmask 0   ;;  %v234_v10 = vld [vmem:[%s472_s4] sm:$0xff]  ;;  %v36_v22 = vld [vmem:[%s470_s2 + $0x8] sm:$0xff] }
   0x6   :  { %333 = vmatprep.mubr.msk.f32.mxu1 %vm383_vm2, %v382_v9  ;;  %28 = vst.msk [vmem:[#allocation3] sm:$0x1] %vm27_vm3, %v382_v9  ;;  %v384_v11 = vmov 0   ;;  %235 = vxpose.xlu1.b32.start.end [1/1] (short) (narrow) %v234_v10, 8  ;;  %v35_v23 = vld [vmem:[%s470_s2] sm:$0xff]  ;;  %v280_v43 = vlaneseq  ;;  %s385_s2 = smov [#allocation5]  }
   0x7   :  { %124 = vadd.xlane.f32.xlu0 %v123_v7  ;;  %26 = vst.msk [vmem:[#allocation2] sm:$0x1] %vm25_vm4, %v382_v9  ;;  %v37_v32 = vld [vmem:[%s471_s3] sm:$0xff]  ;;  %s304_s3 = sshll.u32 %s385_s2, 4  ;;  %s305_s3 = int_to_ptr.vmem [resolvable:$true] %s304_s3 }
   0x8   :  { %327 = vmatmul.mubr.msk.f32.vlgmr.msra.gmra.mrb[0].mxu0 %vm38_vm0, %v32_v4  ;;  %350 = vset.pattern.permute.xlu0 %v384_v11  ;;  %v281_v47 = vshrl.u32 %v280_v43, 7  ;;  %s357_s7 = scalar_lea.vmem %s305_s3, 16  ;;  %s361_s8 = scalar_lea.vmem %s305_s3, 32 }
   0x9   :  { %p358_p0 = scmp.ne.s32.totalorder %s305_s3, %s357_s7  ;;  %p362_p1 = scmp.lt.s32.totalorder %s305_s3, %s305_s3 }
   0xa   :  { %v282_v48 = vsub.s32 0, %v281_v47  ;;  %p363_p2 = scmp.lt.s32.totalorder %s361_s8, %s357_s7 }
   0xc   :  { %v153_v42 = vld [vmem:[#allocation4] sm:$0xff]  ;;  %p364_p3 = por %p363_p2, %p362_p1 }
   0xd   :  { %v137_v39 = vld [vmem:[#allocation3] sm:$0x1] }
   0xe   :  { %v120_v19 = vld [vmem:[#allocation2] sm:$0x1]  ;;  %p365_p4 = pnand %p364_p3, %p358_p0 }
  0x86   :  { %v251_v50 = vpop.trf.xlu1 }
  0x94   :  { %v125_v12 = vpop.xlane.xlu0 %124 }
  0x95   :  { %v126_v13 = vrot.slane %v125_v12, 4 }
  0x97   :  { %v127_v14 = vadd.f32 %v126_v13, %v125_v12 }
  0x99   :  { %v128_v15 = vrot.slane %v127_v14, 2 }
  0x9b   :  { %v129_v16 = vadd.f32 %v128_v15, %v127_v14 }
  0x9d   :  { %v130_v17 = vrot.slane %v129_v16, 1 }
  0x9f   :  { %v131_v18 = vadd.f32 %v130_v17, %v129_v16 }
  0xa1   :  { %343 = vpush %v131_v18 }
  0xd2   :  { %s344_s26 = spop %343 }
  0xd3   :  { %v133_v20 = vstv %s344_s26 }
  0xd4   :  { %v134_v21 = vadd.f32 %v133_v20, %v120_v19 }
  0xd6   :  { %136 = vst.msk [vmem:[#allocation2] sm:$0x1] %vm25_vm4, %v134_v21 }
  0xdb   :  { %v328_v24 = vpop.f32.mrb[0].mxu0 }
  0xdc   :  { %v139_v25 = vmul.f32 %v328_v24, %v36_v22  ;;  %v111_v26 = vpop.f32.mrb[1].mxu0 }
  0xdd   :  { %v232_v27 = vld [vmem:[#allocation2] sm:$0x1]  ;;  %v138_v28 = vmul.f32 %v111_v26, %v35_v23  ;;  %v341_v29 = vpack.c.bf16 %v328_v24, %v111_v26 }
  0xde   :  { %277 = vperm.xlu0 %350, %v232_v27   ;;  %v142_v30 = vsel %vm29_vm1, %v139_v25, 0.0 }
  0xdf   :  { %v141_v31 = vsel %vm29_vm1, %v138_v28, 0.0  ;;  %342 = vmatpush3.bf16.msra.mxu1 %v341_v29 }
  0xe0   :  { %v143_v33 = vadd.f32 %v142_v30, %v141_v31 }
  0xe2   :  { %v144_v34 = vrot.slane %v143_v33, 4  ;;  %334 = vmatmul.mubr.msk.f32.vlgmr.msra.gmra.mrb[0].mxu1 %vm38_vm0, %v37_v32 }
  0xe4   :  { %v145_v35 = vadd.f32 %v144_v34, %v143_v33 }
  0xe6   :  { %v146_v36 = vrot.slane %v145_v35, 2 }
  0xe8   :  { %v147_v37 = vadd.f32 %v146_v36, %v145_v35 }
  0xea   :  { %v148_v38 = vrot.slane %v147_v37, 1 }
  0xec   :  { %v149_v40 = vadd.f32 %v148_v38, %v147_v37 }
  0xee   :  { %v150_v41 = vadd.f32 %v149_v40, %v137_v39 }
  0xf0   :  { %152 = vst.msk [vmem:[#allocation3] sm:$0x1] %vm27_vm3, %v150_v41 }
  0xf7   :  { %v290_v2 = vld [vmem:[#allocation3] sm:$0x1] }
 0x15d   :  { %v278_v49 = vpop.permute.xlu0 %277 }
 0x15e   :  { %v283_v52 = vrot.slane %v278_v49, %v282_v48 }
 0x160   :  { %351 = vrcp.f32 %v283_v52 }
 0x16a   :  { %v352_v61 = vpop.eup %351 }
 0x1b5   :  { %v223_v44 = vpop.f32.mrb[0].mxu1 }
 0x1b6   :  { %v227_v45 = vadd.f32 %v223_v44, %v153_v42  ;;  %v335_v46 = vpop.f32.mrb[1].mxu1 }
 0x1b8   :  { %228 = vst.msk [vmem:[#allocation4] sm:$0xff] %vm29_vm1, %v227_v45 }
 0x1bf   :  { %v233_v51 = vld [vmem:[#allocation4] sm:$0xff] }
 0x1c0   :  { %v267_v53 = vmul.f32 %v251_v50, %v233_v51 }
 0x1c2   :  { %v268_v54 = vsel %vm29_vm1, %v267_v53, 0.0 }
 0x1c3   :  { %v269_v55 = vrot.slane %v268_v54, 4 }
 0x1c5   :  { %v270_v56 = vadd.f32 %v269_v55, %v268_v54 }
 0x1c7   :  { %v271_v57 = vrot.slane %v270_v56, 2 }
 0x1c9   :  { %v272_v58 = vadd.f32 %v271_v57, %v270_v56 }
 0x1cb   :  { %v273_v59 = vrot.slane %v272_v58, 1 }
 0x1cd   :  { %v274_v60 = vadd.f32 %v273_v59, %v272_v58 }
 0x1cf   :  { %v285_v62 = vmul.f32 %v352_v61, %v274_v60 }
 0x1d1   :  { %353 = vlog2.f32 %v285_v62 }
 0x1d2   :  { %355 = vrcp.f32 %v232_v27 }
 0x1db   :  { %v354_v63 = vpop.eup %353 }
 0x1dc   :  { %v287_v0 = vmul.f32 0.6931472, %v354_v63  ;;  %v356_v5 = vpop.eup %355 }
 0x1de   :  { %v289_v1 = vmul.f32 1.442695, %v287_v0 }
 0x1e0   :  { %v291_v3 = vmul.f32 %v290_v2, %v289_v1 }
 0x1e2   :  { %v292_v4 = vsel %vm27_vm3, %v291_v3, 0.0 }
 0x1e3   :  { %293 = vadd.xlane.f32.xlu1 %v292_v4 }
 0x270   :  { %v294_v6 = vpop.xlane.xlu1 %293 }
 0x271   :  { %v296_v7 = vmul.f32 %v356_v5, %v294_v6 }
 0x273   :  { %297 = vst.msk [vmem:[#allocation5] sm:$0x1] %vm25_vm4, %v296_v7 }
 0x274   :  { %368 = shalt.err (!%p365_p4)
}
 0x275   :  { %s369_s11 = scalar_lea.hbm %s473_s5, 16 }
 0x276   :  { %p370_p5 = scmp.ne.s32.totalorder %s473_s5, %s369_s11  ;;  %p373_p6 = scmp.lt.u32.totalorder %s369_s11, %s473_s5 }
 0x278   :  { %p375_p7 = pnand %p373_p6, %p370_p5 }
 0x27a   :  { %378 = shalt.err (!%p375_p7)
}
 0x27b   :  { %307 = dma.vmem_to_hbm [thread:$0]  %s305_s3, 16, %s473_s5, [#allocation6]  }
 0x27c   :  { %379 = dma.done.wait [#allocation6], 16  }
 0x27d   :  { %380 = vsyncadd [#allocation6], 4294967280 }
 0x27e   :  { %311 = vsyncpa [#allocation6], 1 }

</bundles_post_ra>
